<compile_context>
chip_gen: v6e
topology: v6e:2x2x1
jax: 0.10.0
libtpu: 0.0.40
codegen_flags: <defaults>
</compile_context>

<pallas_src>
import functools

import jax
import jax.numpy as jnp
from jax import lax
from jax.experimental import pallas as pl
from jax.experimental.pallas import tpu as pltpu


def _round_up(x, m):
    return (x + m - 1) // m * m


def _pad2d(a, rows, cols):
    pr, pc = rows - a.shape[0], cols - a.shape[1]
    if pr or pc:
        a = jnp.pad(a, ((0, pr), (0, pc)))
    return a


def _sparse_linear_kernel(x_ref, w_ref, m_ref, o_ref, acc_ref):
    """One (tm, tn) output tile; accumulates over the K grid axis."""
    k = pl.program_id(2)

    @pl.when(k == 0)
    def _init():
        acc_ref[...] = jnp.zeros_like(acc_ref)

    # Apply the connectivity mask on the VPU (int8 mask cast to weight dtype),
    # then contract over in_features on the MXU without an explicit transpose:
    # (tm, tk) x (tn, tk) -> (tm, tn), contracting dim 1 of both operands.
    masked_w = w_ref[...] * m_ref[...].astype(w_ref.dtype)
    acc_ref[...] += lax.dot_general(
        x_ref[...],
        masked_w,
        dimension_numbers=(((1,), (1,)), ((), ())),
        preferred_element_type=jnp.float32,
    )

    @pl.when(k == pl.num_programs(2) - 1)
    def _finalize():
        o_ref[...] = acc_ref[...].astype(o_ref.dtype)


def sparse_linear(x, weight, mask, *, compute_dtype=jnp.float32,
                  tm=256, tn=512, tk=1024):
    """output = x @ (weight * mask).T, computed with a tiled Pallas kernel.

    x      : (B, in_features)
    weight : (out_features, in_features)
    mask   : (out_features, in_features)   binary connectivity matrix
    """
    B, K = x.shape
    N, Kw = weight.shape
    assert K == Kw, "in_features mismatch"
    assert weight.shape == mask.shape, "mask must match weight shape"

    # Clamp tiles to the (padded) problem size while respecting the (8, 128)
    # tiling rule: sublane dims multiples of 8, lane dims multiples of 128.
    tm = min(tm, _round_up(B, 8))
    tn = min(tn, _round_up(N, 128))   # lane-dense output stores
    tk = min(tk, _round_up(K, 128))

    Bp, Np, Kp = _round_up(B, tm), _round_up(N, tn), _round_up(K, tk)

    # Zero padding is exact: padded K contributes 0 to the dot product; padded
    # B rows / N columns are sliced off below.
    x_p = _pad2d(x.astype(compute_dtype), Bp, Kp)
    w_p = _pad2d(weight.astype(compute_dtype), Np, Kp)
    m_p = _pad2d(mask.astype(jnp.int8), Np, Kp)      # int8: 4x less HBM than f32

    grid = (Bp // tm, Np // tn, Kp // tk)

    elem = jnp.dtype(compute_dtype).itemsize
    cost = pl.CostEstimate(
        flops=2 * B * K * N,
        transcendentals=0,
        bytes_accessed=(Bp * Kp * elem          # x
                        + Np * Kp * elem        # weight
                        + Np * Kp * 1           # int8 mask
                        + Bp * Np * 4),         # f32 output
    )

    out_p = pl.pallas_call(
        _sparse_linear_kernel,
        out_shape=jax.ShapeDtypeStruct((Bp, Np), jnp.float32),
        grid_spec=pltpu.PrefetchScalarGridSpec(
            num_scalar_prefetch=0,
            grid=grid,
            in_specs=[
                pl.BlockSpec((tm, tk), lambda i, j, k: (i, k)),   # x
                pl.BlockSpec((tn, tk), lambda i, j, k: (j, k)),   # weight
                pl.BlockSpec((tn, tk), lambda i, j, k: (j, k)),   # mask (int8)
            ],
            out_specs=pl.BlockSpec((tm, tn), lambda i, j, k: (i, j)),
            scratch_shapes=[pltpu.VMEM((tm, tn), jnp.float32)],   # accumulator
        ),
        compiler_params=pltpu.CompilerParams(
            dimension_semantics=("parallel", "parallel", "arbitrary"),
            vmem_limit_bytes=32 * 1024 * 1024,   # explicit budget, safe on v5e/v6e/v7x
        ),
        cost_estimate=cost,
    )(x_p, w_p, m_p)

    return out_p[:B, :N]


def xavier_uniform(key, out_features, in_features):
    # Matches nn.init.xavier_uniform_: U(-a, a), a = sqrt(6 / (fan_in + fan_out))
    a = jnp.sqrt(6.0 / (in_features + out_features))
    return jax.random.uniform(
        key, (out_features, in_features), jnp.float32, minval=-a, maxval=a
    )


if __name__ == "__main__":
    B, in_features, out_features = 8, 32, 16

    key = jax.random.PRNGKey(0)
    k_w, k_x, k_m = jax.random.split(key, 3)

    # Deterministic parameter init (xavier uniform, as in the module's __init__).
    weight = xavier_uniform(k_w, out_features, in_features)

    # Deterministic binary connectivity matrix (same shape as weight).
    mask = (jax.random.uniform(k_m, (out_features, in_features)) > 0.5).astype(
        jnp.float32
    )

    x = jax.random.normal(k_x, (B, in_features), jnp.float32)

    ref = x @ (weight * mask).T

    # fp32 compute path (exact match with the PyTorch FloatTensor semantics).
    out_f32 = jax.block_until_ready(sparse_linear(x, weight, mask))
    assert out_f32.shape == (B, out_features)
    assert jnp.allclose(out_f32, ref, atol=1e-5, rtol=1e-5)

    # bf16 compute path (MXU-native on v6e/v7x), fp32 accumulate -> looser check.
    out_bf16 = jax.block_until_ready(
        sparse_linear(x, weight, mask, compute_dtype=jnp.bfloat16)
    )
    assert out_bf16.shape == (B, out_features)
    assert jnp.allclose(out_bf16, ref, atol=5e-2, rtol=5e-2)

    print("KERNEL_OK")
</pallas_src>

<mosaic_0001>
module attributes {stable_mosaic.version = 11 : i64} {
  func.func @_sparse_linear_kernel(%arg0: i32, %arg1: i32, %arg2: i32, %arg3: memref<8x128xf32, #tpu.memory_space<vmem>>, %arg4: memref<128x128xf32, #tpu.memory_space<vmem>>, %arg5: memref<128x128xi8, #tpu.memory_space<vmem>>, %arg6: memref<8x128xf32, #tpu.memory_space<vmem>>, %arg7: memref<8x128xf32, #tpu.memory_space<vmem>>) attributes {dimension_semantics = [#tpu.dimension_semantics<parallel>, #tpu.dimension_semantics<parallel>, #tpu.dimension_semantics<arbitrary>], iteration_bounds = array<i64: 1, 1, 1>, scalar_prefetch = 0 : i64, scratch_operands = 1 : i64, tpu.core_type = #tpu.core_type<tc>, window_params = [{transform_indices = @transform_0, window_bounds = array<i64: 8, 128>}, {transform_indices = @transform_1, window_bounds = array<i64: 128, 128>}, {transform_indices = @transform_2, window_bounds = array<i64: 128, 128>}, {transform_indices = @transform_3, window_bounds = array<i64: 8, 128>}]} {
    %c0_i32 = arith.constant 0 : i32
    %0 = arith.cmpi eq, %arg2, %c0_i32 : i32
    %1 = arith.extui %0 : i1 to i32
    %c0_i32_0 = arith.constant 0 : i32
    %2 = arith.cmpi ne, %1, %c0_i32_0 : i32
    scf.if %2 {
      %cst_12 = arith.constant 0.000000e+00 : f32
      %15 = vector.broadcast %cst_12 : f32 to vector<8x128xf32>
      %c0_13 = arith.constant 0 : index
      %c0_14 = arith.constant 0 : index
      %16 = vector.load %arg7[%c0_13, %c0_14] : memref<8x128xf32, #tpu.memory_space<vmem>>, vector<8x128xf32>
      tpu.vector_store %arg7[%c0_13, %c0_14], %15 {strides = array<i32>} : memref<8x128xf32, #tpu.memory_space<vmem>>, vector<8x128xf32>,
    } else {
    }
    %c0 = arith.constant 0 : index
    %c0_1 = arith.constant 0 : index
    %3 = vector.load %arg4[%c0, %c0_1] : memref<128x128xf32, #tpu.memory_space<vmem>>, vector<128x128xf32>
    %c0_2 = arith.constant 0 : index
    %c0_3 = arith.constant 0 : index
    %4 = vector.load %arg5[%c0_2, %c0_3] : memref<128x128xi8, #tpu.memory_space<vmem>>, vector<128x128xi8>
    %5 = arith.sitofp %4 : vector<128x128xi8> to vector<128x128xf32>
    %6 = arith.mulf %3, %5 : vector<128x128xf32>
    %c0_4 = arith.constant 0 : index
    %c0_5 = arith.constant 0 : index
    %7 = vector.load %arg7[%c0_4, %c0_5] : memref<8x128xf32, #tpu.memory_space<vmem>>, vector<8x128xf32>
    %c0_6 = arith.constant 0 : index
    %c0_7 = arith.constant 0 : index
    %8 = vector.load %arg3[%c0_6, %c0_7] : memref<8x128xf32, #tpu.memory_space<vmem>>, vector<8x128xf32>
    %cst = arith.constant dense<0.000000e+00> : vector<8x128xf32>
    %9 = tpu.matmul %8, %6, %cst {dimension_numbers = #tpu.dot_dimension_numbers<[1], [1], [0], [0], [0, 0, 1, 0], [], []>} : vector<8x128xf32>, vector<128x128xf32>, vector<8x128xf32> -> vector<8x128xf32>
    %10 = arith.addf %7, %9 : vector<8x128xf32>
    %c0_8 = arith.constant 0 : index
    %c0_9 = arith.constant 0 : index
    %11 = vector.load %arg7[%c0_8, %c0_9] : memref<8x128xf32, #tpu.memory_space<vmem>>, vector<8x128xf32>
    tpu.vector_store %arg7[%c0_8, %c0_9], %10 {strides = array<i32>} : memref<8x128xf32, #tpu.memory_space<vmem>>, vector<8x128xf32>,
    %c0_i32_10 = arith.constant 0 : i32
    %12 = arith.cmpi eq, %arg2, %c0_i32_10 : i32
    %13 = arith.extui %12 : i1 to i32
    %c0_i32_11 = arith.constant 0 : i32
    %14 = arith.cmpi ne, %13, %c0_i32_11 : i32
    scf.if %14 {
      %c0_12 = arith.constant 0 : index
      %c0_13 = arith.constant 0 : index
      %15 = vector.load %arg7[%c0_12, %c0_13] : memref<8x128xf32, #tpu.memory_space<vmem>>, vector<8x128xf32>
      %c0_14 = arith.constant 0 : index
      %c0_15 = arith.constant 0 : index
      %16 = vector.load %arg6[%c0_14, %c0_15] : memref<8x128xf32, #tpu.memory_space<vmem>>, vector<8x128xf32>
      tpu.vector_store %arg6[%c0_14, %c0_15], %15 {strides = array<i32>} : memref<8x128xf32, #tpu.memory_space<vmem>>, vector<8x128xf32>,
    } else {
    }
    return
  }
  func.func @transform_0(%arg0: i32, %arg1: i32, %arg2: i32) -> (i32, i32) {
    %c0_i32 = arith.constant 0 : i32
    return %arg0, %arg2 : i32, i32
  }
  func.func @transform_1(%arg0: i32, %arg1: i32, %arg2: i32) -> (i32, i32) {
    %c0_i32 = arith.constant 0 : i32
    return %arg1, %arg2 : i32, i32
  }
  func.func @transform_2(%arg0: i32, %arg1: i32, %arg2: i32) -> (i32, i32) {
    %c0_i32 = arith.constant 0 : i32
    return %arg1, %arg2 : i32, i32
  }
  func.func @transform_3(%arg0: i32, %arg1: i32, %arg2: i32) -> (i32, i32) {
    %c0_i32 = arith.constant 0 : i32
    return %arg0, %arg1 : i32, i32
  }
}

</mosaic_0001>

<bundles_post_ra>
// kernel: tpu_custom_call.1
= control target key start
LH: loop header
LB: loop body
LE: loop exit
PB: predicated region body
PF: predicated region fallthrough
CT: control target
= control target key end

     0   :  { %8 = vsyncpa [#allocation4], 0  ;;  %s425_s0 = inlined_call_operand.hbm [shape: f32[8,128], index: 0, kind: input, shape index: {}]   ;;  %s426_s1 = inlined_call_operand.hbm [shape: f32[128,128], index: 1, kind: input, shape index: {}]   ;;  %s427_s2 = inlined_call_operand.hbm [shape: s8[128,128], index: 2, kind: input, shape index: {}]   ;;  %s428_s3 = inlined_call_operand.hbm [shape: f32[8,128], index: 3, kind: output, shape index: {}]  }
   0x1   :  { %9 = vsyncpa [#allocation7], 0 }
   0x2   :  { %10 = vsyncpa [#allocation5], 0  ;;  %s368_s12 = smov [#allocation6]  }
   0x3   :  { %s26_s13 = sshll.u32 %s368_s12, 4  ;;  %s27_s13 = int_to_ptr.vmem [resolvable:$true] %s26_s13 }
   0x4   :  { %s290_s14 = scalar_lea.vmem %s27_s13, 2048  ;;  %p295_p1 = scmp.lt.s32.totalorder %s27_s13, %s27_s13 }
   0x5   :  { %p291_p0 = scmp.ne.s32.totalorder %s27_s13, %s290_s14  ;;  %p296_p2 = scmp.lt.s32.totalorder %s290_s14, %s290_s14 }
   0x7   :  { %p297_p3 = por %p296_p2, %p295_p1 }
   0x9   :  { %p298_p4 = pnand %p297_p3, %p291_p0 }
   0xb   :  { %301 = shalt.err (!%p298_p4)
}
   0xc   :  { %s369_s15 = smov 128   ;;  %s370_s16 = smov 8  }
   0xd   :  { %32 = dma.hbm_to_vmem [thread:$0]  %s426_s1, 2048, %s27_s13, [#allocation7], %s369_s15, %s369_s15, %s370_s16  }
   0xe   :  { %s371_s19 = smov [#allocation3]   ;;  %s372_s21 = smov [#allocation8]  }
   0xf   :  { %s17_s20 = sshll.u32 %s371_s19, 4  ;;  %s38_s22 = sshll.u32 %s372_s21, 4  ;;  %s18_s20 = int_to_ptr.vmem [resolvable:$true] %s17_s20  ;;  %s39_s22 = int_to_ptr.vmem [resolvable:$true] %s38_s22 }
  0x10   :  { %s310_s23 = scalar_lea.vmem %s18_s20, 128  ;;  %p315_p6 = scmp.lt.s32.totalorder %s18_s20, %s18_s20 }
  0x11   :  { %p311_p5 = scmp.ne.s32.totalorder %s18_s20, %s310_s23  ;;  %p316_p7 = scmp.lt.s32.totalorder %s310_s23, %s310_s23 }
  0x13   :  { %p317_p8 = por %p316_p7, %p315_p6 }
  0x15   :  { %p318_p9 = pnand %p317_p8, %p311_p5 }
  0x17   :  { %321 = shalt.err (!%p318_p9)
}
  0x18   :  { %20 = dma.hbm_to_vmem [thread:$0]  %s425_s0, 128, %s18_s20, [#allocation4]  }
  0x19   :  { %s330_s26 = scalar_lea.vmem %s39_s22, 512  ;;  %p335_p11 = scmp.lt.s32.totalorder %s39_s22, %s39_s22 }
  0x1a   :  { %p331_p10 = scmp.ne.s32.totalorder %s39_s22, %s330_s26  ;;  %p336_p12 = scmp.lt.s32.totalorder %s330_s26, %s330_s26 }
  0x1c   :  { %p337_p13 = por %p336_p12, %p335_p11 }
  0x1e   :  { %p338_p0 = pnand %p337_p13, %p331_p10 }
  0x20   :  { %341 = shalt.err (!%p338_p0)
}
  0x21   :  { %44 = dma.hbm_to_vmem [thread:$0]  %s427_s2, 512, %s39_s22, [#allocation7], %s369_s15, %s369_s15, %s370_s16  }
  0x22   :  { %362 = dma.done.wait [#allocation4], 128  }
  0x23   :  { %363 = vsyncadd [#allocation4], 4294967168 }
  0x24   :  { %364 = dma.done.wait [#allocation7], 2560  }
  0x25   :  { %365 = vsyncadd [#allocation7], 4294964736  ;;  %v373_v0 = vmov 0.0   ;;  %vm374_vm0 = vmmov 0   ;;  %v78_v1 = vld [vmem:[#allocation8 + $0x18] sm:$0xff]  ;;  %v73_v8 = vld [vmem:[#allocation6 + $0x70] sm:$0xff] }
  0x26   :  { %239 = vmatprep.subr.mxu0 %v373_v0  ;;  %271 = vmatprep.mubr.msk.f32.mxu0 %vm374_vm0, %v373_v0  ;;  %v94_v2 = vunpack.c.3.s8 %v78_v1  ;;  %v93_v3 = vunpack.c.2.s8 %v78_v1  ;;  %v74_v4 = vld [vmem:[#allocation6 + $0x78] sm:$0xff]  ;;  %v92_v7 = vunpack.c.1.s8 %v78_v1  ;;  %v91_v12 = vunpack.c.0.s8 %v78_v1  ;;  %v72_v13 = vld [vmem:[#allocation6 + $0x68] sm:$0xff]  ;;  %v77_v14 = vld [vmem:[#allocation8 + $0x10] sm:$0xff]  ;;  %s375_s0 = smov [#allocation9]  }
  0x27   :  { %v90_v17 = vunpack.c.3.s8 %v77_v14  ;;  %v71_v18 = vld [vmem:[#allocation6 + $0x60] sm:$0xff]  ;;  %v89_v21 = vunpack.c.2.s8 %v77_v14  ;;  %v70_v22 = vld [vmem:[#allocation6 + $0x58] sm:$0xff]  ;;  %v88_v25 = vunpack.c.1.s8 %v77_v14  ;;  %v69_v26 = vld [vmem:[#allocation6 + $0x50] sm:$0xff]  ;;  %v87_v29 = vunpack.c.0.s8 %v77_v14  ;;  %s212_s2 = sshll.u32 %s375_s0, 4  ;;  %s213_s2 = int_to_ptr.vmem [resolvable:$true] %s212_s2 }
  0x28   :  { %v110_v5 = vcvt.s32.f32 %v94_v2  ;;  %v109_v6 = vcvt.s32.f32 %v93_v3  ;;  %v108_v11 = vcvt.s32.f32 %v92_v7  ;;  %v107_v16 = vcvt.s32.f32 %v91_v12  ;;  %v68_v30 = vld [vmem:[#allocation6 + $0x48] sm:$0xff]  ;;  %v67_v35 = vld [vmem:[#allocation6 + $0x40] sm:$0xff]  ;;  %v66_v39 = vld [vmem:[#allocation6 + $0x38] sm:$0xff]  ;;  %s342_s28 = scalar_lea.vmem %s213_s2, 128  ;;  %p347_p2 = scmp.lt.s32.totalorder %s213_s2, %s213_s2 }
  0x29   :  { %v106_v20 = vcvt.s32.f32 %v90_v17  ;;  %v105_v24 = vcvt.s32.f32 %v89_v21  ;;  %v104_v28 = vcvt.s32.f32 %v88_v25  ;;  %v76_v31 = vld [vmem:[#allocation8 + $0x8] sm:$0xff]  ;;  %v103_v33 = vcvt.s32.f32 %v87_v29  ;;  %v65_v43 = vld [vmem:[#allocation6 + $0x30] sm:$0xff]  ;;  %v75_v48 = vld [vmem:[#allocation8] sm:$0xff]  ;;  %p343_p1 = scmp.ne.s32.totalorder %s213_s2, %s342_s28  ;;  %p348_p3 = scmp.lt.s32.totalorder %s342_s28, %s342_s28 }
  0x2a   :  { %v126_v9 = vmul.f32 %v110_v5, %v74_v4  ;;  %v125_v10 = vmul.f32 %v109_v6, %v73_v8  ;;  %v124_v15 = vmul.f32 %v108_v11, %v72_v13  ;;  %v123_v19 = vmul.f32 %v107_v16, %v71_v18  ;;  %v64_v47 = vld [vmem:[#allocation6 + $0x28] sm:$0xff]  ;;  %v63_v52 = vld [vmem:[#allocation6 + $0x20] sm:$0xff]  ;;  %v62_v56 = vld [vmem:[#allocation6 + $0x18] sm:$0xff] }
  0x2b   :  { %v122_v23 = vmul.f32 %v106_v20, %v70_v22  ;;  %v121_v27 = vmul.f32 %v105_v24, %v69_v26  ;;  %v120_v32 = vmul.f32 %v104_v28, %v68_v30  ;;  %v86_v34 = vunpack.c.3.s8 %v76_v31  ;;  %v61_v60 = vld [vmem:[#allocation6 + $0x10] sm:$0xff]  ;;  %v60_v1 = vld [vmem:[#allocation6 + $0x8] sm:$0xff]  ;;  %v59_v4 = vld [vmem:[#allocation6] sm:$0xff]  ;;  %p349_p4 = por %p348_p3, %p347_p2 }
  0x2c   :  { %240 = vmatpush3.xpose.msra.mxu0 %v126_v9  ;;  %v119_v36 = vmul.f32 %v103_v33, %v67_v35  ;;  %v85_v38 = vunpack.c.2.s8 %v76_v31  ;;  %v84_v42 = vunpack.c.1.s8 %v76_v31  ;;  %v83_v46 = vunpack.c.0.s8 %v76_v31  ;;  %v128_v6 = vld [vmem:[#allocation3] sm:$0xff] }
  0x2d   :  { %241 = vmatprep.subr.mxu0 %v373_v0  ;;  %v102_v37 = vcvt.s32.f32 %v86_v34  ;;  %v82_v51 = vunpack.c.3.s8 %v75_v48  ;;  %v81_v55 = vunpack.c.2.s8 %v75_v48  ;;  %v80_v59 = vunpack.c.1.s8 %v75_v48  ;;  %p350_p5 = pnand %p349_p4, %p343_p1 }
  0x2e   :  { %v101_v41 = vcvt.s32.f32 %v85_v38  ;;  %v100_v45 = vcvt.s32.f32 %v84_v42  ;;  %v99_v50 = vcvt.s32.f32 %v83_v46  ;;  %v79_v63 = vunpack.c.0.s8 %v75_v48 }
  0x2f   :  { %v118_v40 = vmul.f32 %v102_v37, %v66_v39  ;;  %v98_v54 = vcvt.s32.f32 %v82_v51  ;;  %v97_v58 = vcvt.s32.f32 %v81_v55  ;;  %v96_v62 = vcvt.s32.f32 %v80_v59 }
  0x30   :  { %242 = vmatpush3.xpose.msra.mxu0 %v125_v10  ;;  %v117_v44 = vmul.f32 %v101_v41, %v65_v43  ;;  %v116_v49 = vmul.f32 %v100_v45, %v64_v47  ;;  %v115_v53 = vmul.f32 %v99_v50, %v63_v52  ;;  %v95_v3 = vcvt.s32.f32 %v79_v63 }
  0x31   :  { %243 = vmatprep.subr.mxu0 %v373_v0  ;;  %v114_v57 = vmul.f32 %v98_v54, %v62_v56  ;;  %v113_v61 = vmul.f32 %v97_v58, %v61_v60  ;;  %v112_v2 = vmul.f32 %v96_v62, %v60_v1 }
  0x32   :  { %v111_v5 = vmul.f32 %v95_v3, %v59_v4 }
  0x34   :  { %244 = vmatpush3.xpose.msra.mxu0 %v124_v15 }
  0x35   :  { %245 = vmatprep.subr.mxu0 %v373_v0 }
  0x38   :  { %246 = vmatpush3.xpose.msra.mxu0 %v123_v19 }
  0x39   :  { %247 = vmatprep.subr.mxu0 %v373_v0 }
  0x3c   :  { %248 = vmatpush3.xpose.msra.mxu0 %v122_v23 }
  0x3d   :  { %249 = vmatprep.subr.mxu0 %v373_v0 }
  0x40   :  { %250 = vmatpush3.xpose.msra.mxu0 %v121_v27 }
  0x41   :  { %251 = vmatprep.subr.mxu0 %v373_v0 }
  0x44   :  { %252 = vmatpush3.xpose.msra.mxu0 %v120_v32 }
  0x45   :  { %253 = vmatprep.subr.mxu0 %v373_v0 }
  0x48   :  { %254 = vmatpush3.xpose.msra.mxu0 %v119_v36 }
  0x49   :  { %255 = vmatprep.subr.mxu0 %v373_v0 }
  0x4c   :  { %256 = vmatpush3.xpose.msra.mxu0 %v118_v40 }
  0x4d   :  { %257 = vmatprep.subr.mxu0 %v373_v0 }
  0x50   :  { %258 = vmatpush3.xpose.msra.mxu0 %v117_v44 }
  0x51   :  { %259 = vmatprep.subr.mxu0 %v373_v0 }
  0x54   :  { %260 = vmatpush3.xpose.msra.mxu0 %v116_v49 }
  0x55   :  { %261 = vmatprep.subr.mxu0 %v373_v0 }
  0x58   :  { %262 = vmatpush3.xpose.msra.mxu0 %v115_v53 }
  0x59   :  { %263 = vmatprep.subr.mxu0 %v373_v0 }
  0x5c   :  { %264 = vmatpush3.xpose.msra.mxu0 %v114_v57 }
  0x5d   :  { %265 = vmatprep.subr.mxu0 %v373_v0 }
  0x60   :  { %266 = vmatpush3.xpose.msra.mxu0 %v113_v61 }
  0x61   :  { %267 = vmatprep.subr.mxu0 %v373_v0 }
  0x64   :  { %268 = vmatpush3.xpose.msra.mxu0 %v112_v2 }
  0x65   :  { %269 = vmatprep.subr.mxu0 %v373_v0 }
  0x68   :  { %270 = vmatpush3.xpose.msra.mxu0 %v111_v5 }
  0x6b   :  { %272 = vmatmul.mubr.f32.vlgmr.msra.gmra.mxu0 %v128_v6 }
 0x12b   :  { %v195_v7 = vpop.f32.mrf.mxu0 }
 0x12c   :  { %205 = vst [vmem:[#allocation9] sm:$0xff] %v195_v7 }
 0x12d   :  { %v273_v8 = vpop.f32.mrf.mxu0 }
 0x12e   :  { %353 = shalt.err (!%p350_p5)
}
 0x12f   :  { %215 = dma.vmem_to_hbm [thread:$0]  %s213_s2, 128, %s428_s3, [#allocation5]  }
 0x130   :  { %366 = dma.done.wait [#allocation5], 128  }
 0x131   :  { %367 = vsyncadd [#allocation5], 4294967168 }
 0x132   :  { %219 = vsyncpa [#allocation4], 1 }
 0x133   :  { %220 = vsyncpa [#allocation7], 1 }
 0x134   :  { %221 = vsyncpa [#allocation5], 1 }

</bundles_post_ra>
